<compile_context>
chip_gen: v6e
topology: v6e:2x2x1
jax: 0.10.0
libtpu: 0.0.40
codegen_flags: <defaults>
</compile_context>

<pallas_src>
import numpy as np
import jax
import jax.numpy as jnp
from jax.experimental import pallas as pl
from jax.experimental.pallas import tpu as pltpu


# ----------------------------- config -------------------------------------
class Config:
    image_size = 16
    patch_size = 8
    num_channels = 3
    hidden_size = 32
    num_frames = 4
    tubelet_size = 2


def get_sinusoid_encoding_table(n_position, d_hid):
    """Same table as the original VideoMAE implementation, (1, n_position, d_hid)."""
    pos = np.arange(n_position, dtype=np.float64)[:, None]
    hid = np.arange(d_hid, dtype=np.float64)[None, :]
    angle = pos / np.power(10000.0, 2.0 * np.floor(hid / 2.0) / d_hid)
    table = np.zeros((n_position, d_hid), dtype=np.float64)
    table[:, 0::2] = np.sin(angle[:, 0::2])
    table[:, 1::2] = np.cos(angle[:, 1::2])
    return jnp.asarray(table[None, :, :], dtype=jnp.float32)


# --------------------------- Pallas kernel ---------------------------------
def _patch_embed_kernel(x_ref, w_ref, pos_ref, o_ref):
    # x_ref: (1, tn, K) bf16   w_ref: (K, Hd) bf16
    # pos_ref: (tn, Hd) bf16 (conv bias folded in)   o_ref: (1, tn, Hd) bf16
    y = jnp.dot(x_ref[0], w_ref[...],
                preferred_element_type=jnp.float32)           # MXU bf16 matmul, f32 acc
    o_ref[0] = (y + pos_ref[...].astype(jnp.float32)).astype(o_ref.dtype)


def _pick_tn(N, cap=512):
    """Row-tile size along the patch axis.

    cap=512 keeps the per-step block set inside v5e's 16 MiB scoped-VMEM
    default and well under v7x's 64 MiB physical (sweep 512-1024 per
    generation at production shapes).  For medium N we split in two so the
    "parallel" n axis has >= 2 steps and both v7x TensorCores get work.
    """
    if N > cap:
        # largest multiple-of-8 divisor of N that fits the cap (keeps the pos
        # block from ever indexing past N); fall back to a ragged cdiv grid.
        for t in range(cap, 7, -8):
            if N % t == 0:
                return t
        return cap
    if N % 16 == 0 and N >= 16:
        return N // 2          # grid_n = 2 -> megacore sharding even at small N
    return N


def patch_embed_pallas(patches, w2d, pos_bias, *, tn=None):
    """patches: (B, N, K) bf16; w2d: (K, Hd) bf16; pos_bias: (N, Hd) bf16."""
    B, N, K = patches.shape
    Hd = w2d.shape[1]
    if tn is None:
        tn = _pick_tn(N)
    grid_n = pl.cdiv(N, tn)

    # Double-buffered block footprint (all streams bf16 = 2 B/elem).
    vmem_need = 2 * 2 * (tn * K + K * Hd + 2 * tn * Hd)
    vmem_limit = int(min(max(2 * vmem_need, 8 << 20), 40 << 20))

    return pl.pallas_call(
        _patch_embed_kernel,
        out_shape=jax.ShapeDtypeStruct((B, N, Hd), jnp.bfloat16),
        grid_spec=pltpu.PrefetchScalarGridSpec(
            num_scalar_prefetch=0,
            # batch is the innermost (fastest) axis: the pos block index is
            # unchanged across consecutive b steps, so Pallas skips its re-DMA.
            grid=(grid_n, B),
            in_specs=[
                pl.BlockSpec((1, tn, K), lambda n, b: (b, n, 0)),
                pl.BlockSpec((K, Hd), lambda n, b: (0, 0)),    # grid-invariant weight
                pl.BlockSpec((tn, Hd), lambda n, b: (n, 0)),   # pos+bias, shared across b
            ],
            out_specs=pl.BlockSpec((1, tn, Hd), lambda n, b: (b, n, 0)),
        ),
        compiler_params=pltpu.CompilerParams(
            dimension_semantics=("parallel", "arbitrary"),
            vmem_limit_bytes=vmem_limit),
    )(patches, w2d, pos_bias)


# ------------------------------ forward ------------------------------------
def videomae_embeddings_forward(pixel_values, bool_masked_pos, landmarks,
                                conv_w, conv_b, pos_table, cfg):
    """pixel_values: (B, num_frames, C, H, W) float32 (PyTorch layout)."""
    B, T, C, Himg, Wimg = pixel_values.shape
    assert C == cfg.num_channels
    assert Himg == cfg.image_size and Wimg == cfg.image_size
    p = cfg.patch_size
    tub = cfg.tubelet_size
    Tp, Hp, Wp = T // tub, Himg // p, Wimg // p
    N = Tp * Hp * Wp
    K = C * tub * p * p
    Hd = cfg.hidden_size

    # --- glue: extract non-overlapping tubelet patches, ordered (t', h', w') ---
    # Cast to bf16 BEFORE the im2col transpose so the cast fuses into it and
    # the transpose's HBM write traffic is halved.
    x = pixel_values.astype(jnp.bfloat16)
    x = jnp.transpose(x, (0, 2, 1, 3, 4))                     # (B, C, T, H, W)
    x = x.reshape(B, C, Tp, tub, Hp, p, Wp, p)
    x = jnp.transpose(x, (0, 2, 4, 6, 1, 3, 5, 7))            # (B, Tp, Hp, Wp, C, tub, p, p)
    patches = x.reshape(B, N, K)                              # (B, N, K) bf16

    w2d = conv_w.reshape(Hd, K).T.astype(jnp.bfloat16)        # (K, Hd) bf16
    # fold conv bias into the position slab; stored bf16, upcast in-kernel
    pos_bias = (pos_table[0, :N, :] + conv_b[None, :]).astype(jnp.bfloat16)  # (N, Hd)

    # --- hot path in Pallas: projection matmul + (bias+pos) add ---
    emb = patch_embed_pallas(patches, w2d, pos_bias)          # (B, N, Hd) bf16
    # A production consumer would take bf16 directly; upcast here only for the
    # f32 concat/gather glue below.
    emb = emb.astype(jnp.float32)

    # --- landmarks concat (they also receive their slice of pos embeddings) ---
    if landmarks is not None:
        L = landmarks.shape[1]
        lm = landmarks.astype(jnp.float32) + pos_table[0, N:N + L, :][None]
        emb = jnp.concatenate([emb, lm], axis=1)              # (B, N+L, Hd)

    # --- boolean-mask token selection (data-dependent gather, kept in JAX glue) ---
    # NOTE: like the original module, this assumes every row masks the same
    # number of tokens; the host-side count means this wrapper is not jittable
    # end-to-end with a traced mask.
    if bool_masked_pos is not None:
        Tt = emb.shape[1]
        n_keep = Tt - int(np.asarray(bool_masked_pos[0]).sum())
        order = jnp.argsort(bool_masked_pos.astype(jnp.int32), axis=1, stable=True)
        keep_idx = order[:, :n_keep]                          # unmasked positions, in order
        emb = jnp.take_along_axis(emb, keep_idx[:, :, None], axis=1)
    return emb


# ------------------------------ reference ----------------------------------
def reference_forward(pixel_values, bool_masked_pos, landmarks,
                      conv_w, conv_b, pos_table, cfg):
    p, tub = cfg.patch_size, cfg.tubelet_size
    x = jnp.transpose(pixel_values, (0, 2, 1, 3, 4))          # (B, C, T, H, W)
    y = jax.lax.conv_general_dilated(
        x, conv_w, window_strides=(tub, p, p), padding="VALID",
        dimension_numbers=("NCDHW", "OIDHW", "NCDHW"))
    y = y + conv_b[None, :, None, None, None]
    B, Hd = y.shape[0], y.shape[1]
    emb = jnp.transpose(y.reshape(B, Hd, -1), (0, 2, 1))       # (B, N, Hd)
    if landmarks is not None:
        emb = jnp.concatenate([emb, landmarks.astype(jnp.float32)], axis=1)
    t = emb.shape[1]
    emb = emb + pos_table[:, :t, :]
    if bool_masked_pos is not None:
        n_keep = t - int(np.asarray(bool_masked_pos[0]).sum())
        order = jnp.argsort(bool_masked_pos.astype(jnp.int32), axis=1, stable=True)
        emb = jnp.take_along_axis(emb, order[:, :n_keep, None], axis=1)
    return emb


# -------------------------------- main --------------------------------------
if __name__ == "__main__":
    cfg = Config()
    B = 2
    T = cfg.num_frames
    C = cfg.num_channels
    S = cfg.image_size
    p = cfg.patch_size
    tub = cfg.tubelet_size
    Hd = cfg.hidden_size
    N = (T // tub) * (S // p) * (S // p)          # 8 patches
    L = 2                                         # landmark tokens
    T_total = N + L

    key = jax.random.PRNGKey(0)
    k_px, k_w, k_b, k_lm, k_mask = jax.random.split(key, 5)

    pixel_values = jax.random.normal(k_px, (B, T, C, S, S), dtype=jnp.float32)
    conv_w = jax.random.normal(k_w, (Hd, C, tub, p, p), dtype=jnp.float32) * 0.02
    conv_b = jax.random.normal(k_b, (Hd,), dtype=jnp.float32) * 0.02
    landmarks = jax.random.normal(k_lm, (B, L, Hd), dtype=jnp.float32)

    # deterministic boolean mask with the same number of masked tokens per row
    num_masked = 4
    scores = jax.random.uniform(k_mask, (B, T_total))
    rank = jnp.argsort(scores, axis=1)
    bool_masked_pos = jnp.zeros((B, T_total), dtype=bool)
    bool_masked_pos = bool_masked_pos.at[
        jnp.arange(B)[:, None], rank[:, :num_masked]].set(True)

    pos_table = get_sinusoid_encoding_table(N + 150, Hd)

    out = videomae_embeddings_forward(
        pixel_values, bool_masked_pos, landmarks, conv_w, conv_b, pos_table, cfg)
    out = jax.block_until_ready(out)

    ref = reference_forward(
        pixel_values, bool_masked_pos, landmarks, conv_w, conv_b, pos_table, cfg)
    ref = jax.block_until_ready(ref)

    assert out.shape == (B, T_total - num_masked, Hd), out.shape
    # tolerance reflects bf16 matmul operands + bf16 pos/output storage
    # (accumulation is still f32); error is ~1e-2 abs worst-case at these scales.
    np.testing.assert_allclose(np.asarray(out), np.asarray(ref),
                               rtol=3e-2, atol=3e-2)
    print("KERNEL_OK")
</pallas_src>

<mosaic_0001>
module attributes {stable_mosaic.version = 11 : i64} {
  func.func @_patch_embed_kernel(%arg0: i32, %arg1: i32, %arg2: memref<1x8x384xbf16, #tpu.memory_space<vmem>>, %arg3: memref<384x32xbf16, #tpu.memory_space<vmem>>, %arg4: memref<8x32xbf16, #tpu.memory_space<vmem>>, %arg5: memref<1x8x32xbf16, #tpu.memory_space<vmem>>) attributes {dimension_semantics = [#tpu.dimension_semantics<parallel>, #tpu.dimension_semantics<arbitrary>], iteration_bounds = array<i64: 1, 2>, scalar_prefetch = 0 : i64, scratch_operands = 0 : i64, tpu.core_type = #tpu.core_type<tc>, window_params = [{transform_indices = @transform_0, window_bounds = array<i64: 1, 8, 384>}, {pipeline_mode = #tpu.pipeline_mode<synchronous>, transform_indices = @transform_1, window_bounds = array<i64: 384, 32>}, {transform_indices = @transform_2, window_bounds = array<i64: 8, 32>}, {transform_indices = @transform_3, window_bounds = array<i64: 1, 8, 32>}]} {
    %c0 = arith.constant 0 : index
    %c0_0 = arith.constant 0 : index
    %c0_1 = arith.constant 0 : index
    %0 = vector.load %arg2[%c0, %c0_0, %c0_1] : memref<1x8x384xbf16, #tpu.memory_space<vmem>>, vector<1x8x384xbf16>
    %1 = vector.shape_cast %0 : vector<1x8x384xbf16> to vector<8x384xbf16>
    %c0_2 = arith.constant 0 : index
    %c0_3 = arith.constant 0 : index
    %2 = vector.load %arg3[%c0_2, %c0_3] : memref<384x32xbf16, #tpu.memory_space<vmem>>, vector<384x32xbf16>
    %cst = arith.constant dense<0.000000e+00> : vector<8x32xf32>
    %3 = tpu.matmul %1, %2, %cst {dimension_numbers = #tpu.dot_dimension_numbers<[1], [0], [0], [1], [0, 0, 1, 1], [], []>} : vector<8x384xbf16>, vector<384x32xbf16>, vector<8x32xf32> -> vector<8x32xf32>
    %c0_4 = arith.constant 0 : index
    %c0_5 = arith.constant 0 : index
    %4 = vector.load %arg4[%c0_4, %c0_5] : memref<8x32xbf16, #tpu.memory_space<vmem>>, vector<8x32xbf16>
    %5 = arith.extf %4 : vector<8x32xbf16> to vector<8x32xf32>
    %6 = arith.addf %3, %5 : vector<8x32xf32>
    %7 = arith.truncf %6 : vector<8x32xf32> to vector<8x32xbf16>
    %c0_6 = arith.constant 0 : index
    %c0_7 = arith.constant 0 : index
    %c0_8 = arith.constant 0 : index
    %8 = vector.load %arg5[%c0_6, %c0_7, %c0_8] : memref<1x8x32xbf16, #tpu.memory_space<vmem>>, vector<1x8x32xbf16>
    %9 = vector.shape_cast %8 : vector<1x8x32xbf16> to vector<8x32xbf16>
    %10 = vector.shape_cast %7 : vector<8x32xbf16> to vector<1x8x32xbf16>
    tpu.vector_store %arg5[%c0_6, %c0_7, %c0_8], %10 {strides = array<i32>} : memref<1x8x32xbf16, #tpu.memory_space<vmem>>, vector<1x8x32xbf16>,
    return
  }
  func.func @transform_0(%arg0: i32, %arg1: i32) -> (i32, i32, i32) {
    %c0_i32 = arith.constant 0 : i32
    %c0_i32_0 = arith.constant 0 : i32
    return %arg1, %arg0, %c0_i32 : i32, i32, i32
  }
  func.func @transform_1(%arg0: i32, %arg1: i32) -> (i32, i32) {
    %c0_i32 = arith.constant 0 : i32
    %c0_i32_0 = arith.constant 0 : i32
    %c0_i32_1 = arith.constant 0 : i32
    return %c0_i32, %c0_i32_0 : i32, i32
  }
  func.func @transform_2(%arg0: i32, %arg1: i32) -> (i32, i32) {
    %c0_i32 = arith.constant 0 : i32
    %c0_i32_0 = arith.constant 0 : i32
    return %arg0, %c0_i32 : i32, i32
  }
  func.func @transform_3(%arg0: i32, %arg1: i32) -> (i32, i32, i32) {
    %c0_i32 = arith.constant 0 : i32
    %c0_i32_0 = arith.constant 0 : i32
    return %arg1, %arg0, %c0_i32 : i32, i32, i32
  }
}

</mosaic_0001>

<bundles_post_ra>
// kernel: tpu_custom_call.1
= control target key start
LH: loop header
LB: loop body
LE: loop exit
PB: predicated region body
PF: predicated region fallthrough
CT: control target
= control target key end

     0   :  { %8 = vsyncpa [#allocation3], 0  ;;  %s1062_s0 = inlined_call_operand.vmem [shape: bf16[2,8,384], index: 0, kind: input, shape index: {}]   ;;  %s1063_s1 = inlined_call_operand.vmem [shape: bf16[384,32], index: 1, kind: input, shape index: {}]   ;;  %s1064_s2 = inlined_call_operand.vmem [shape: bf16[8,32], index: 2, kind: input, shape index: {}]   ;;  %s1065_s3 = inlined_call_operand.hbm [shape: bf16[2,8,32], index: 3, kind: output, shape index: {}]  }
   0x1   :  { %10 = vsyncpa [#allocation3 + $0x1], 0  ;;  %s888_s12 = smov 0   ;;  %s890_s13 = smov 0  }
   0x2   :  { %s892_s14 = smov 0   ;;  %s894_s15 = smov 0  }
   0x3   :  { %s896_s16 = smov 0   ;;  %s898_s17 = smov 0  }
   0x4 LB: > { %s612_s18 = sadd.s32 4294967295, %s863_s17   ;;  %s613_s19 = sadd.s32 4294967294, %s863_s17   ;;  %s863_s17 = sphi %s898_s17, %s16_s17   ;;  %s859_s16 = sphi %s896_s16, %s1072_s16   ;;  %s855_s15 = sphi %s894_s15, %s1071_s15   ;;  %s851_s14 = sphi %s892_s14, %s1070_s14   ;;  %s847_s13 = sphi %s890_s13, %s1069_s13   ;;  %s843_s12 = sphi %s888_s12, %s1068_s12  }
   0x5   : > { %s25_s20 = sadd.s32 1, %s859_s16  ;;  %s112_s21 = sadd.s32 1, %s851_s14 }
   0x6   : > { %p26_p0 = scmp.ge.s32.totalorder %s25_s20, 2  ;;  %p122_p1 = scmp.ne.s32.totalorder %s851_s14, %s847_s13 }
   0x7   : > { %p123_p2 = scmp.eq.s32.totalorder %s612_s18, 1  ;;  %p128_p3 = scmp.ne.s32.totalorder %s847_s13, %s843_s12 }
   0x8   : > { %s1074_s20 = smov (%p26_p0, %s25_s20), 0  ;;  %p129_p5 = scmp.eq.s32.totalorder %s613_s19, 1 }
   0x9   : > { %p928_p4 = por %p123_p2, %p122_p1  ;;  %s107_s23 = ssub.s32 %s859_s16, %s1074_s20 }
   0xa   : > { %p617_p6 = scmp.ge.s32.totalorder %s863_s17, 1  ;;  %p110_p7 = scmp.eq.s32.totalorder %s107_s23, 0 }
   0xb   : > { %p935_p8 = por %p129_p5, %p128_p3  ;;  %p169_p9 = scmp.lt.s32.totalorder %s863_s17, 3 }
   0xc   : > { %s941_s25 = scalar_select %p110_p7, %s851_s14, %s112_s21  }
   0xd   : > { %p170_p10 = pnand %p617_p6, %p169_p9 }
   0xe   : > { %p201_p11 = scmp.lt.s32.totalorder (!%p170_p10), %s855_s15, 1  ;;  %s198_s28 = sand.u32 (!%p170_p10), 1, %s847_s13  }
   0xf   : > { %173 = sbr.rel (%p170_p10) target bundleno = 269 (0x10d), region = 32  ;;  %s618_s4 = sshll.u32 (!%p170_p10), %s198_s28, 2 }
  0x10   : > { %s648_s5 = sshll.u32 (!%p170_p10), %s855_s15, 6  ;;  %s200_s6 = scalar_lea.vmem (!%p170_p10), [#allocation2], %s618_s4 }
  0x11   : > { %s518_s10 = scalar_lea.hbm (!%p170_p10), %s1065_s3, %s648_s5  ;;  %s506_s11 = scalar_lea.sflag (!%p170_p10), [#allocation3], %s198_s28 }
  0x12   : > { %s867_s19 = smov (!%p170_p10), [#allocation2]  }
  0x14   : > { %v760_v0 = vld [vmem:[%s1063_s1 + $0x78] sm:$0xff]   ;;  %v865_v1 = vmov 0.0   ;;  %v763_v4 = vld [vmem:[%s1063_s1 + $0x70] sm:$0xff]   ;;  %vm866_vm0 = vmmov 0   ;;  %v766_v7 = vld [vmem:[%s1063_s1 + $0x68] sm:$0xff]   ;;  %s202_s8 = scalar_select %p201_p11, %s855_s15, 1 }
  0x15   : > { %682 = vmatprep.subr.bf16.mxu1 %v865_v1  ;;  %v761_v2 = vld [vmem:[%s1063_s1 + $0x38] sm:$0xff]   ;;  %651 = vmatprep.subr.bf16.mxu0 %v760_v0  ;;  %v764_v5 = vld [vmem:[%s1063_s1 + $0x30] sm:$0xff]   ;;  %v767_v8 = vld [vmem:[%s1063_s1 + $0x28] sm:$0xff]   ;;  %vm503_vm1 = vcmask 257024   ;;  %s791_s15 = sshll.u32 %s867_s19, 4  ;;  %s792_s15 = int_to_ptr.vmem [resolvable:$false] %s791_s15 }
  0x16   : > { %v762_v3 = vld [vmem:[%s1063_s1 + $0xb8] sm:$0xff]   ;;  %652 = vmatpush3.bf16.msra.mxu0 %v761_v2  ;;  %698 = vmatprep.mubr.msk.bf16.mxu1 %vm866_vm0, %v865_v1  ;;  %v765_v6 = vld [vmem:[%s1063_s1 + $0xb0] sm:$0xff]   ;;  %v768_v9 = vld [vmem:[%s1063_s1 + $0xa8] sm:$0xff]   ;;  %s702_s23 = smul.u32 12, %s202_s8  ;;  %s793_s21 = scalar_lea.vmem %s792_s15, 128 }
  0x17   : > { %683 = vmatpush3.bf16.msra.mxu1 %v762_v3  ;;  %653 = vmatprep.subr.bf16.mxu0 %v763_v4  ;;  %v769_v10 = vld [vmem:[%s1063_s1 + $0x60] sm:$0xff]   ;;  %v772_v13 = vld [vmem:[%s1063_s1 + $0x58] sm:$0xff]   ;;  %v775_v16 = vld [vmem:[%s1063_s1 + $0x50] sm:$0xff]  }
  0x18   : > { %684 = vmatprep.subr.bf16.mxu1 %v865_v1  ;;  %v770_v11 = vld [vmem:[%s1063_s1 + $0x20] sm:$0xff]   ;;  %v773_v14 = vld [vmem:[%s1063_s1 + $0x18] sm:$0xff]   ;;  %v776_v17 = vld [vmem:[%s1063_s1 + $0x10] sm:$0xff]   ;;  %s209_s7 = scalar_lea.vmem %s1062_s0, %s702_s23 }
  0x19   : > { %v771_v12 = vld [vmem:[%s1063_s1 + $0xa0] sm:$0xff]   ;;  %v774_v15 = vld [vmem:[%s1063_s1 + $0x98] sm:$0xff]   ;;  %v777_v18 = vld [vmem:[%s1063_s1 + $0x90] sm:$0xff]  }
  0x1a   : > { %654 = vmatpush3.bf16.msra.mxu0 %v764_v5  ;;  %v778_v19 = vld [vmem:[%s1063_s1 + $0x48] sm:$0xff]   ;;  %v781_v22 = vld [vmem:[%s1063_s1 + $0x40] sm:$0xff]  }
  0x1b   : > { %685 = vmatpush3.bf16.msra.mxu1 %v765_v6  ;;  %655 = vmatprep.subr.bf16.mxu0 %v766_v7  ;;  %v779_v20 = vld [vmem:[%s1063_s1 + $0x8] sm:$0xff]   ;;  %v215_v23 = vld [vmem:[%s209_s7] sm:$0xff] }
  0x1c   : > { %686 = vmatprep.subr.bf16.mxu1 %v865_v1  ;;  %v780_v21 = vld [vmem:[%s1063_s1 + $0x88] sm:$0xff]   ;;  %v621_v24 = vcombine.high %v215_v23, %v215_v23  ;;  %v782_v25 = vld [vmem:[%s1063_s1] sm:$0xff]   ;;  %v620_v27 = vcombine.low %v215_v23, %v215_v23 }
  0x1d   : > { %v783_v26 = vld [vmem:[%s1063_s1 + $0x80] sm:$0xff]   ;;  %v786_v28 = vld [vmem:[%s209_s7 + $0x8] ss:$0 sps:$4 sm:$0xff]   ;;  %s520_s7 = sshll.u32 %s200_s6, 4  ;;  %s521_s7 = int_to_ptr.vmem [resolvable:$true] %s520_s7 }
  0x1e   : > { %656 = vmatpush3.bf16.msra.mxu0 %v767_v8  ;;  %454 = vmatprep.mubr.bf16.mxu0 %v621_v24  ;;  %v265_v29 = vld [vmem:[%s1064_s2] sm:$0xf]  ;;  %s787_s18 = scalar_lea.vmem %s521_s7, 64  ;;  %p794_p1 = scmp.lt.s32.totalorder %s521_s7, %s792_s15 }
  0x1f   : > { %687 = vmatpush3.bf16.msra.mxu1 %v768_v9  ;;  %657 = vmatprep.subr.bf16.mxu0 %v769_v10  ;;  %v266_v32 = vunpack.c.l.bf16 %v265_v29  ;;  %p788_p12 = scmp.ne.s32.totalorder %s521_s7, %s787_s18  ;;  %p795_p2 = scmp.lt.s32.totalorder %s793_s21, %s787_s18 }
  0x20   : > { %688 = vmatprep.subr.bf16.mxu1 %v865_v1 }
  0x21   : > { %p789_p13 = pnand %p788_p12, %p928_p4  ;;  %p796_p3 = por %p795_p2, %p794_p1 }
  0x22   : > { %658 = vmatpush3.bf16.msra.mxu0 %v770_v11 }
  0x23   : > { %689 = vmatpush3.bf16.msra.mxu1 %v771_v12  ;;  %659 = vmatprep.subr.bf16.mxu0 %v772_v13  ;;  %p790_p0 = pneg %p789_p13 }
  0x24   : > { %690 = vmatprep.subr.bf16.mxu1 %v865_v1 }
  0x25   : > { %p797_p5 = pnand %p796_p3, %p790_p0 }
  0x26   : > { %660 = vmatpush3.bf16.msra.mxu0 %v773_v14 }
  0x27   : > { %691 = vmatpush3.bf16.msra.mxu1 %v774_v15  ;;  %661 = vmatprep.subr.bf16.mxu0 %v775_v16 }
  0x28   : > { %692 = vmatprep.subr.bf16.mxu1 %v865_v1 }
  0x2a   : > { %662 = vmatpush3.bf16.msra.mxu0 %v776_v17 }
  0x2b   : > { %693 = vmatpush3.bf16.msra.mxu1 %v777_v18  ;;  %663 = vmatprep.subr.bf16.mxu0 %v778_v19 }
  0x2c   : > { %694 = vmatprep.subr.bf16.mxu1 %v865_v1 }
  0x2e   : > { %664 = vmatpush3.bf16.msra.mxu0 %v779_v20 }
  0x2f   : > { %695 = vmatpush3.bf16.msra.mxu1 %v780_v21  ;;  %665 = vmatprep.subr.bf16.mxu0 %v781_v22 }
  0x30   : > { %696 = vmatprep.subr.bf16.mxu1 %v865_v1 }
  0x32   : > { %666 = vmatpush3.bf16.msra.mxu0 %v782_v25 }
  0x33   : > { %697 = vmatpush3.bf16.msra.mxu1 %v783_v26 }
  0x35   : > { %455 = vmatmul.mubr.bf16.vlgmr.msra.gmra.mxu0 %v620_v27 }
  0x36   : > { %699 = vmatmul.mubr.bf16.vlgmr.msra.gmra.mxu1 %v786_v28 }
  0xf5   : > { %v667_v30 = vpop.f32.mrf.mxu0 }
  0xf6   : > { %v496_v31 = vpop.f32.mrf.mxu1 }
  0xf7   : > { %v668_v33 = vpop.f32.mrf.mxu0 }
  0xf8   : > { %v669_v34 = vadd.f32 %v668_v33, %v667_v30  ;;  %v700_v35 = vpop.f32.mrf.mxu1 }
  0xf9   : > { %v670_v36 = vpop.f32.mrf.mxu0 }
  0xfa   : > { %v457_v37 = vadd.f32 %v669_v34, %v266_v32  ;;  %v499_v38 = vpop.f32.mrf.mxu1 }
  0xfb   : > { %v671_v39 = vpop.f32.mrf.mxu0 }
  0xfc   : > { %v497_v40 = vadd.f32 %v496_v31, %v457_v37  ;;  %v701_v41 = vpop.f32.mrf.mxu1 }
  0xfe   : > { %v502_v42 = vpack.c.bf16 %v497_v40, %v497_v40 }
 0x100   : > { %504 = vst.msk [vmem:[%s200_s6] sm:$0xf] %vm503_vm1, %v502_v42 }
 0x101   : > { %800 = shalt.err (!%p797_p5)
}
 0x102   : > { %s801_s23 = scalar_lea.hbm %s518_s10, 64  ;;  %s805_s28 = scalar_lea.hbm %s1065_s3, 128 }
 0x103   : > { %p802_p6 = scmp.ne.s32.totalorder %s518_s10, %s801_s23  ;;  %p806_p10 = scmp.lt.s32.totalorder %s518_s10, %s1065_s3 }
 0x104   : > { %p807_p11 = scmp.lt.s32.totalorder %s805_s28, %s801_s23 }
 0x105   : > { %p803_p7 = pnand %p802_p6, %p928_p4 }
 0x106   : > { %p808_p12 = por %p807_p11, %p806_p10 }
 0x107   : > { %p804_p9 = pneg %p803_p7 }
 0x109   : > { %p809_p13 = pnand %p808_p12, %p804_p9 }
 0x10b   : > { %812 = shalt.err (!%p809_p13)
}
 0x10c   : > { %703 = dma.vmem_to_hbm [thread:$0]  (%p928_p4), %s521_s7, 64, %s518_s10, %s506_s11  }
 0x10d PF: > { %p709_p0 = scmp.ge.s32.totalorder %s863_s17, 2  ;;  %s532_s4 = sand.u32 1, %s843_s12  }
 0x10e   : > { %s533_s5 = scalar_lea.sflag [#allocation3], %s532_s4 }
 0x10f   : > { %p706_p1 = pnand %p709_p0, %p935_p8 }
 0x111   : > { %p707_p2 = pneg %p706_p1 }
 0x113   : > { %838 = dma.done.wait (%p707_p2), %s533_s5, 64  }
 0x114   : > { %840 = vsyncadd (%p707_p2), %s533_s5, 4294967232  ;;  %s16_s17 = sadd.s32 1, %s863_s17   ;;  %s1068_s12 = smov %s847_s13 }
 0x115   : > { %p13_p3 = scmp.ge.s32.totalorder %s16_s17, 4   ;;  %s1069_s13 = smov %s851_s14 }
 0x116   : > { %s1070_s14 = smov %s941_s25  ;;  %s1071_s15 = smov %s859_s16 }
 0x117   : > { %s1072_s16 = smov %s1074_s20  ;;  %15 = sbr.rel (!%p13_p3) target bundleno = 4 (0x4), region = 70 }
 0x11c   :  { %538 = vsyncpa [#allocation3], 1 }
 0x11d   :  { %540 = vsyncpa [#allocation3 + $0x1], 1 }

</bundles_post_ra>
